<compile_context>
chip_gen: v7x
topology: tpu7x:2x2x1
jax: 0.10.0
libtpu: 0.0.40
codegen_flags: <defaults>
</compile_context>

<pallas_src>
from typing import NamedTuple, Sequence, Tuple

import jax
import jax.numpy as jnp
from jax import lax
from jax.experimental import pallas as pl
from jax.experimental.pallas import tpu as pltpu


class MetricSumOutput(NamedTuple):
    metric_sum: jax.Array   # (B, T, C) float32, or (B, T) if num_classes == 0
    cnt: jax.Array          # (B, T, C) int32,   or (B, T)


def _effective_thresholds(thresholds: Sequence[float]) -> Tuple[float, ...]:
    """Mirror MetricInRange: sort, keep only strictly increasing values > 0."""
    out = []
    prev = 0.0
    for th in sorted(float(t) for t in thresholds):
        if th <= prev:
            continue
        out.append(th)
        prev = th
    if not out:
        raise ValueError("no usable thresholds (all <= 0 or duplicates)")
    return tuple(out)


def _pick_tile(P: int, C: int) -> int:
    """Pixel (lane) tile: big multiple of 128 to amortize per-grid-step
    overhead, capped so a (C, tile) f32 intermediate stays <= ~4 MiB
    (comfortably VMEM-safe on v5e/v6e/v7x), never larger than padded P."""
    p_round = ((P + 127) // 128) * 128
    cap_by_c = max(128, ((4 * 1024 * 1024) // (4 * max(C, 1))) // 128 * 128)
    return max(128, min(8192, p_round, cap_by_c))


def _make_kernel(thresholds: Tuple[float, ...], C: int, T: int, P: int,
                 tile: int, with_seg: bool):
    def kernel(*refs):
        if with_seg:
            pred_ref, gt_ref, seg_ref, ape_ref, cnt_ref = refs
        else:
            pred_ref, gt_ref, ape_ref, cnt_ref = refs

        i = pl.program_id(1)

        # Zero the resident accumulator blocks on the first pixel tile.
        @pl.when(i == 0)
        def _():
            ape_ref[...] = jnp.zeros_like(ape_ref)
            cnt_ref[...] = jnp.zeros_like(cnt_ref)

        gt = gt_ref[0].astype(jnp.float32)       # (1, tile)
        pred = pred_ref[0].astype(jnp.float32)   # (1, tile)

        # Ragged last tile handled in-kernel (no jnp.pad HBM copy in wrapper).
        lane = lax.broadcasted_iota(jnp.int32, (1, tile), 1)
        valid = (i * tile + lane) < P            # (1, tile) bool

        # |pred - gt| / gt ; masked-out pixels use a guarded divisor so no
        # inf/nan leaks (select below picks 0 for them anyway).
        ape = jnp.abs(pred - gt) / jnp.where(gt != 0.0, gt, 1.0)

        if with_seg:
            seg = seg_ref[0]                                      # (1, tile) i32
            cid = lax.broadcasted_iota(jnp.int32, (C, 1), 0)      # (C, 1) column
            cls_ok = (cid == seg) & valid                         # (C, tile)
        else:
            cls_ok = valid                                        # (1, tile), C == 1

        tcol = lax.broadcasted_iota(jnp.int32, (C, T), 1)         # (C, T)
        ape_acc = jnp.zeros((C, T), jnp.float32)
        cnt_acc = jnp.zeros((C, T), jnp.int32)

        prev = 0.0
        for t, th in enumerate(thresholds):                       # static unroll
            in_r = (gt > prev) & (gt <= th) & (gt <= 1.0)         # (1, tile)
            m = cls_ok & in_r                                     # (C, tile)
            s_ape = jnp.sum(jnp.where(m, ape, 0.0), axis=1, keepdims=True)   # (C,1)
            s_cnt = jnp.sum(m.astype(jnp.int32), axis=1, keepdims=True)      # (C,1)
            ape_acc = ape_acc + jnp.where(tcol == t, s_ape, 0.0)
            cnt_acc = cnt_acc + jnp.where(tcol == t, s_cnt, 0)
            prev = th

        # Single full-block accumulate per tile.
        ape_ref[...] += ape_acc[None]
        cnt_ref[...] += cnt_acc[None]

    return kernel


def metric_batch_sum_ape(pred, gt, seg_gt=None, *,
                         thresholds: Sequence[float] = (1.0,),
                         num_classes: int = 0) -> MetricSumOutput:
    """pred, gt: (B, 1, H, W) float; seg_gt: (B, H, W) int if num_classes > 0."""
    ths = _effective_thresholds(thresholds)
    T = len(ths)
    B, one, H, W = pred.shape
    assert one == 1, "pred/gt expected as (B, 1, H, W)"
    assert gt.shape == pred.shape
    P = H * W
    with_seg = num_classes > 0
    C = num_classes if with_seg else 1

    tile = _pick_tile(P, C)
    n_tiles = pl.cdiv(P, tile)

    # Free contiguous reshapes only (no transpose / pad / up-cast in HBM).
    inputs = [pred.reshape(B, 1, P), gt.reshape(B, 1, P)]
    in_specs = [
        pl.BlockSpec((1, 1, tile), lambda b, i: (b, 0, i)),
        pl.BlockSpec((1, 1, tile), lambda b, i: (b, 0, i)),
    ]
    if with_seg:
        assert seg_gt is not None and seg_gt.shape == (B, H, W)
        inputs.append(seg_gt.reshape(B, 1, P).astype(jnp.int32))
        in_specs.append(pl.BlockSpec((1, 1, tile), lambda b, i: (b, 0, i)))

    kernel = _make_kernel(ths, C, T, P, tile, with_seg)

    out_ape, out_cnt = pl.pallas_call(
        kernel,
        out_shape=(
            jax.ShapeDtypeStruct((B, C, T), jnp.float32),
            jax.ShapeDtypeStruct((B, C, T), jnp.int32),
        ),
        grid_spec=pltpu.PrefetchScalarGridSpec(
            num_scalar_prefetch=0,
            grid=(B, n_tiles),
            in_specs=in_specs,
            out_specs=(
                pl.BlockSpec((1, C, T), lambda b, i: (b, 0, 0)),
                pl.BlockSpec((1, C, T), lambda b, i: (b, 0, 0)),
            ),
        ),
        compiler_params=pltpu.CompilerParams(
            dimension_semantics=("parallel", "arbitrary"),  # batch parallel, pixel reduce
            vmem_limit_bytes=32 * 1024 * 1024,
        ),
    )(*inputs)

    # Tiny relayout to the PyTorch output convention (B, T, C) / (B, T).
    ape_sum = jnp.transpose(out_ape, (0, 2, 1))
    cnts = jnp.transpose(out_cnt, (0, 2, 1))
    if not with_seg:
        ape_sum = ape_sum[:, :, 0]
        cnts = cnts[:, :, 0]
    return MetricSumOutput(ape_sum, cnts)


def _reference(pred, gt, seg_gt, thresholds, num_classes):
    """Pure-JAX mirror of MetricBatchSumAPE.forward."""
    ths = _effective_thresholds(thresholds)
    gt_s = gt[:, 0]          # (B, H, W)
    pred_s = pred[:, 0]
    ape = jnp.abs(pred_s - gt_s) / gt_s
    masks = []
    prev = 0.0
    for th in ths:
        masks.append((gt_s > prev) & (gt_s <= th) & (gt_s <= 1.0))
        prev = th
    in_range = jnp.stack(masks, axis=1)                          # (B, T, H, W)
    if num_classes > 0:
        oh = seg_gt[:, :, :, None] == jnp.arange(num_classes)    # (B, H, W, C)
        oh = jnp.transpose(oh, (0, 3, 1, 2))                     # (B, C, H, W)
        mask = in_range[:, :, None, :, :] & oh[:, None, :, :, :] # (B, T, C, H, W)
        ape_e = jnp.where(mask, ape[:, None, None, :, :], 0.0)
        return ape_e.sum(axis=(3, 4)), mask.sum(axis=(3, 4)).astype(jnp.int32)
    else:
        ape_e = jnp.where(in_range, ape[:, None, :, :], 0.0)
        return ape_e.sum(axis=(2, 3)), in_range.sum(axis=(2, 3)).astype(jnp.int32)


if __name__ == "__main__":
    key = jax.random.PRNGKey(0)
    k1, k2, k3 = jax.random.split(key, 3)
    B, C, H, W = 2, 4, 16, 16
    thresholds = [0.25, 0.5, 1.0]

    gt = jax.random.uniform(k1, (B, 1, H, W), minval=0.05, maxval=1.2,
                            dtype=jnp.float32)
    pred = gt + 0.1 * jax.random.normal(k2, (B, 1, H, W), dtype=jnp.float32)
    seg = jax.random.randint(k3, (B, H, W), 0, C, dtype=jnp.int32)

    T = len(_effective_thresholds(thresholds))

    # num_classes > 0 path
    out = metric_batch_sum_ape(pred, gt, seg, thresholds=thresholds, num_classes=C)
    jax.block_until_ready(out)
    ref_sum, ref_cnt = _reference(pred, gt, seg, thresholds, C)
    assert out.metric_sum.shape == (B, T, C) and out.cnt.shape == (B, T, C)
    assert jnp.allclose(out.metric_sum, ref_sum, rtol=1e-5, atol=1e-4), (out.metric_sum, ref_sum)
    assert bool(jnp.all(out.cnt == ref_cnt)), (out.cnt, ref_cnt)

    # num_classes == 0 path
    out0 = metric_batch_sum_ape(pred, gt, None, thresholds=thresholds, num_classes=0)
    jax.block_until_ready(out0)
    ref_sum0, ref_cnt0 = _reference(pred, gt, None, thresholds, 0)
    assert out0.metric_sum.shape == (B, T) and out0.cnt.shape == (B, T)
    assert jnp.allclose(out0.metric_sum, ref_sum0, rtol=1e-5, atol=1e-4), (out0.metric_sum, ref_sum0)
    assert bool(jnp.all(out0.cnt == ref_cnt0)), (out0.cnt, ref_cnt0)

    print("KERNEL_OK")
</pallas_src>

<mosaic_0001>
module attributes {stable_mosaic.version = 11 : i64} {
  func.func @kernel(%arg0: i32, %arg1: i32, %arg2: memref<1x1x256xf32, #tpu.memory_space<vmem>>, %arg3: memref<1x1x256xf32, #tpu.memory_space<vmem>>, %arg4: memref<1x1x256xi32, #tpu.memory_space<vmem>>, %arg5: memref<1x4x3xf32, #tpu.memory_space<vmem>>, %arg6: memref<1x4x3xi32, #tpu.memory_space<vmem>>) attributes {dimension_semantics = [#tpu.dimension_semantics<parallel>, #tpu.dimension_semantics<arbitrary>], iteration_bounds = array<i64: 2, 1>, scalar_prefetch = 0 : i64, scratch_operands = 0 : i64, tpu.core_type = #tpu.core_type<tc>, window_params = [{transform_indices = @transform_0, window_bounds = array<i64: 1, 1, 256>}, {transform_indices = @transform_1, window_bounds = array<i64: 1, 1, 256>}, {transform_indices = @transform_2, window_bounds = array<i64: 1, 1, 256>}, {transform_indices = @transform_3, window_bounds = array<i64: 1, 4, 3>}, {transform_indices = @transform_4, window_bounds = array<i64: 1, 4, 3>}]} {
    %c0_i32 = arith.constant 0 : i32
    %0 = arith.cmpi eq, %arg1, %c0_i32 : i32
    %1 = arith.extui %0 : i1 to i32
    %c0_i32_0 = arith.constant 0 : i32
    %2 = arith.cmpi ne, %1, %c0_i32_0 : i32
    scf.if %2 {
      %cst_53 = arith.constant 0.000000e+00 : f32
      %138 = vector.broadcast %cst_53 : f32 to vector<1x4x3xf32>
      %c0_54 = arith.constant 0 : index
      %c0_55 = arith.constant 0 : index
      %c0_56 = arith.constant 0 : index
      %139 = vector.load %arg5[%c0_54, %c0_55, %c0_56] : memref<1x4x3xf32, #tpu.memory_space<vmem>>, vector<1x4x3xf32>
      tpu.vector_store %arg5[%c0_54, %c0_55, %c0_56], %138 {strides = array<i32>} : memref<1x4x3xf32, #tpu.memory_space<vmem>>, vector<1x4x3xf32>,
      %c0_i32_57 = arith.constant 0 : i32
      %140 = vector.broadcast %c0_i32_57 : i32 to vector<1x4x3xi32>
      %c0_58 = arith.constant 0 : index
      %c0_59 = arith.constant 0 : index
      %c0_60 = arith.constant 0 : index
      %141 = vector.load %arg6[%c0_58, %c0_59, %c0_60] : memref<1x4x3xi32, #tpu.memory_space<vmem>>, vector<1x4x3xi32>
      tpu.vector_store %arg6[%c0_58, %c0_59, %c0_60], %140 {strides = array<i32>} : memref<1x4x3xi32, #tpu.memory_space<vmem>>, vector<1x4x3xi32>,
    } else {
    }
    %c0 = arith.constant 0 : index
    %c0_1 = arith.constant 0 : index
    %c0_2 = arith.constant 0 : index
    %3 = vector.load %arg3[%c0, %c0_1, %c0_2] : memref<1x1x256xf32, #tpu.memory_space<vmem>>, vector<1x1x256xf32>
    %4 = vector.shape_cast %3 : vector<1x1x256xf32> to vector<1x256xf32>
    %c0_3 = arith.constant 0 : index
    %c0_4 = arith.constant 0 : index
    %c0_5 = arith.constant 0 : index
    %5 = vector.load %arg2[%c0_3, %c0_4, %c0_5] : memref<1x1x256xf32, #tpu.memory_space<vmem>>, vector<1x1x256xf32>
    %6 = vector.shape_cast %5 : vector<1x1x256xf32> to vector<1x256xf32>
    %7 = tpu.iota {dimensions = array<i32: 1>} : vector<1x256xi32>
    %c256_i32 = arith.constant 256 : i32
    %8 = arith.muli %arg1, %c256_i32 : i32
    %9 = vector.broadcast %8 : i32 to vector<1x256xi32>
    %10 = arith.addi %9, %7 : vector<1x256xi32>
    %c256_i32_6 = arith.constant 256 : i32
    %11 = vector.broadcast %c256_i32_6 : i32 to vector<1x256xi32>
    %12 = arith.cmpi slt, %10, %11 : vector<1x256xi32>
    %13 = arith.subf %6, %4 : vector<1x256xf32>
    %14 = math.absf %13 : vector<1x256xf32>
    %cst = arith.constant 0.000000e+00 : f32
    %15 = vector.broadcast %cst : f32 to vector<1x256xf32>
    %16 = arith.cmpf one, %4, %15 : vector<1x256xf32>
    %cst_7 = arith.constant 1.000000e+00 : f32
    %17 = vector.broadcast %cst_7 : f32 to vector<1x256xf32>
    %18 = arith.select %16, %4, %17 : vector<1x256xi1>, vector<1x256xf32>
    %19 = arith.divf %14, %18 : vector<1x256xf32>
    %c0_8 = arith.constant 0 : index
    %c0_9 = arith.constant 0 : index
    %c0_10 = arith.constant 0 : index
    %20 = vector.load %arg4[%c0_8, %c0_9, %c0_10] : memref<1x1x256xi32, #tpu.memory_space<vmem>>, vector<1x1x256xi32>
    %21 = vector.shape_cast %20 : vector<1x1x256xi32> to vector<1x256xi32>
    %22 = tpu.iota {dimensions = array<i32: 0>} : vector<4x1xi32>
    %23 = vector.broadcast %22 : vector<4x1xi32> to vector<4x256xi32>
    %24 = vector.broadcast %21 : vector<1x256xi32> to vector<4x256xi32>
    %25 = arith.cmpi eq, %23, %24 : vector<4x256xi32>
    %26 = vector.broadcast %12 : vector<1x256xi1> to vector<4x256xi1>
    %27 = arith.andi %25, %26 : vector<4x256xi1>
    %28 = tpu.iota {dimensions = array<i32: 1>} : vector<4x3xi32>
    %cst_11 = arith.constant 0.000000e+00 : f32
    %29 = vector.broadcast %cst_11 : f32 to vector<4x3xf32>
    %c0_i32_12 = arith.constant 0 : i32
    %30 = vector.broadcast %c0_i32_12 : i32 to vector<4x3xi32>
    %cst_13 = arith.constant 0.000000e+00 : f32
    %31 = vector.broadcast %cst_13 : f32 to vector<1x256xf32>
    %32 = arith.cmpf ogt, %4, %31 : vector<1x256xf32>
    %cst_14 = arith.constant 2.500000e-01 : f32
    %33 = vector.broadcast %cst_14 : f32 to vector<1x256xf32>
    %34 = arith.cmpf ole, %4, %33 : vector<1x256xf32>
    %35 = arith.andi %32, %34 : vector<1x256xi1>
    %cst_15 = arith.constant 1.000000e+00 : f32
    %36 = vector.broadcast %cst_15 : f32 to vector<1x256xf32>
    %37 = arith.cmpf ole, %4, %36 : vector<1x256xf32>
    %38 = arith.andi %35, %37 : vector<1x256xi1>
    %39 = vector.broadcast %38 : vector<1x256xi1> to vector<4x256xi1>
    %40 = arith.andi %27, %39 : vector<4x256xi1>
    %cst_16 = arith.constant 0.000000e+00 : f32
    %41 = vector.shape_cast %19 : vector<1x256xf32> to vector<1x256xf32>
    %42 = vector.broadcast %41 : vector<1x256xf32> to vector<4x256xf32>
    %43 = vector.broadcast %cst_16 : f32 to vector<4x256xf32>
    %44 = arith.select %40, %42, %43 : vector<4x256xi1>, vector<4x256xf32>
    %cst_17 = arith.constant dense<0.000000e+00> : vector<4xf32>
    %45 = vector.multi_reduction <add>, %44, %cst_17 [1] : vector<4x256xf32> to vector<4xf32>
    %46 = vector.shape_cast %45 : vector<4xf32> to vector<4x1xf32>
    %47 = arith.extui %40 : vector<4x256xi1> to vector<4x256xi32>
    %cst_18 = arith.constant dense<0> : vector<4xi32>
    %48 = vector.multi_reduction <add>, %47, %cst_18 [1] : vector<4x256xi32> to vector<4xi32>
    %49 = vector.shape_cast %48 : vector<4xi32> to vector<4x1xi32>
    %c0_i32_19 = arith.constant 0 : i32
    %50 = vector.broadcast %c0_i32_19 : i32 to vector<4x3xi32>
    %51 = arith.cmpi eq, %28, %50 : vector<4x3xi32>
    %cst_20 = arith.constant 0.000000e+00 : f32
    %52 = vector.shape_cast %46 : vector<4x1xf32> to vector<4x1xf32>
    %53 = vector.broadcast %52 : vector<4x1xf32> to vector<4x3xf32>
    %54 = vector.broadcast %cst_20 : f32 to vector<4x3xf32>
    %55 = arith.select %51, %53, %54 : vector<4x3xi1>, vector<4x3xf32>
    %56 = arith.addf %29, %55 : vector<4x3xf32>
    %c0_i32_21 = arith.constant 0 : i32
    %57 = vector.broadcast %c0_i32_21 : i32 to vector<4x3xi32>
    %58 = arith.cmpi eq, %28, %57 : vector<4x3xi32>
    %c0_i32_22 = arith.constant 0 : i32
    %59 = vector.shape_cast %49 : vector<4x1xi32> to vector<4x1xi32>
    %60 = vector.broadcast %59 : vector<4x1xi32> to vector<4x3xi32>
    %61 = vector.broadcast %c0_i32_22 : i32 to vector<4x3xi32>
    %62 = arith.select %58, %60, %61 : vector<4x3xi1>, vector<4x3xi32>
    %63 = arith.addi %30, %62 : vector<4x3xi32>
    %cst_23 = arith.constant 2.500000e-01 : f32
    %64 = vector.broadcast %cst_23 : f32 to vector<1x256xf32>
    %65 = arith.cmpf ogt, %4, %64 : vector<1x256xf32>
    %cst_24 = arith.constant 5.000000e-01 : f32
    %66 = vector.broadcast %cst_24 : f32 to vector<1x256xf32>
    %67 = arith.cmpf ole, %4, %66 : vector<1x256xf32>
    %68 = arith.andi %65, %67 : vector<1x256xi1>
    %cst_25 = arith.constant 1.000000e+00 : f32
    %69 = vector.broadcast %cst_25 : f32 to vector<1x256xf32>
    %70 = arith.cmpf ole, %4, %69 : vector<1x256xf32>
    %71 = arith.andi %68, %70 : vector<1x256xi1>
    %72 = vector.broadcast %71 : vector<1x256xi1> to vector<4x256xi1>
    %73 = arith.andi %27, %72 : vector<4x256xi1>
    %cst_26 = arith.constant 0.000000e+00 : f32
    %74 = vector.shape_cast %19 : vector<1x256xf32> to vector<1x256xf32>
    %75 = vector.broadcast %74 : vector<1x256xf32> to vector<4x256xf32>
    %76 = vector.broadcast %cst_26 : f32 to vector<4x256xf32>
    %77 = arith.select %73, %75, %76 : vector<4x256xi1>, vector<4x256xf32>
    %cst_27 = arith.constant dense<0.000000e+00> : vector<4xf32>
    %78 = vector.multi_reduction <add>, %77, %cst_27 [1] : vector<4x256xf32> to vector<4xf32>
    %79 = vector.shape_cast %78 : vector<4xf32> to vector<4x1xf32>
    %80 = arith.extui %73 : vector<4x256xi1> to vector<4x256xi32>
    %cst_28 = arith.constant dense<0> : vector<4xi32>
    %81 = vector.multi_reduction <add>, %80, %cst_28 [1] : vector<4x256xi32> to vector<4xi32>
    %82 = vector.shape_cast %81 : vector<4xi32> to vector<4x1xi32>
    %c1_i32 = arith.constant 1 : i32
    %83 = vector.broadcast %c1_i32 : i32 to vector<4x3xi32>
    %84 = arith.cmpi eq, %28, %83 : vector<4x3xi32>
    %cst_29 = arith.constant 0.000000e+00 : f32
    %85 = vector.shape_cast %79 : vector<4x1xf32> to vector<4x1xf32>
    %86 = vector.broadcast %85 : vector<4x1xf32> to vector<4x3xf32>
    %87 = vector.broadcast %cst_29 : f32 to vector<4x3xf32>
    %88 = arith.select %84, %86, %87 : vector<4x3xi1>, vector<4x3xf32>
    %89 = arith.addf %56, %88 : vector<4x3xf32>
    %c1_i32_30 = arith.constant 1 : i32
    %90 = vector.broadcast %c1_i32_30 : i32 to vector<4x3xi32>
    %91 = arith.cmpi eq, %28, %90 : vector<4x3xi32>
    %c0_i32_31 = arith.constant 0 : i32
    %92 = vector.shape_cast %82 : vector<4x1xi32> to vector<4x1xi32>
    %93 = vector.broadcast %92 : vector<4x1xi32> to vector<4x3xi32>
    %94 = vector.broadcast %c0_i32_31 : i32 to vector<4x3xi32>
    %95 = arith.select %91, %93, %94 : vector<4x3xi1>, vector<4x3xi32>
    %96 = arith.addi %63, %95 : vector<4x3xi32>
    %cst_32 = arith.constant 5.000000e-01 : f32
    %97 = vector.broadcast %cst_32 : f32 to vector<1x256xf32>
    %98 = arith.cmpf ogt, %4, %97 : vector<1x256xf32>
    %cst_33 = arith.constant 1.000000e+00 : f32
    %99 = vector.broadcast %cst_33 : f32 to vector<1x256xf32>
    %100 = arith.cmpf ole, %4, %99 : vector<1x256xf32>
    %101 = arith.andi %98, %100 : vector<1x256xi1>
    %cst_34 = arith.constant 1.000000e+00 : f32
    %102 = vector.broadcast %cst_34 : f32 to vector<1x256xf32>
    %103 = arith.cmpf ole, %4, %102 : vector<1x256xf32>
    %104 = arith.andi %101, %103 : vector<1x256xi1>
    %105 = vector.broadcast %104 : vector<1x256xi1> to vector<4x256xi1>
    %106 = arith.andi %27, %105 : vector<4x256xi1>
    %cst_35 = arith.constant 0.000000e+00 : f32
    %107 = vector.shape_cast %19 : vector<1x256xf32> to vector<1x256xf32>
    %108 = vector.broadcast %107 : vector<1x256xf32> to vector<4x256xf32>
    %109 = vector.broadcast %cst_35 : f32 to vector<4x256xf32>
    %110 = arith.select %106, %108, %109 : vector<4x256xi1>, vector<4x256xf32>
    %cst_36 = arith.constant dense<0.000000e+00> : vector<4xf32>
    %111 = vector.multi_reduction <add>, %110, %cst_36 [1] : vector<4x256xf32> to vector<4xf32>
    %112 = vector.shape_cast %111 : vector<4xf32> to vector<4x1xf32>
    %113 = arith.extui %106 : vector<4x256xi1> to vector<4x256xi32>
    %cst_37 = arith.constant dense<0> : vector<4xi32>
    %114 = vector.multi_reduction <add>, %113, %cst_37 [1] : vector<4x256xi32> to vector<4xi32>
    %115 = vector.shape_cast %114 : vector<4xi32> to vector<4x1xi32>
    %c2_i32 = arith.constant 2 : i32
    %116 = vector.broadcast %c2_i32 : i32 to vector<4x3xi32>
    %117 = arith.cmpi eq, %28, %116 : vector<4x3xi32>
    %cst_38 = arith.constant 0.000000e+00 : f32
    %118 = vector.shape_cast %112 : vector<4x1xf32> to vector<4x1xf32>
    %119 = vector.broadcast %118 : vector<4x1xf32> to vector<4x3xf32>
    %120 = vector.broadcast %cst_38 : f32 to vector<4x3xf32>
    %121 = arith.select %117, %119, %120 : vector<4x3xi1>, vector<4x3xf32>
    %122 = arith.addf %89, %121 : vector<4x3xf32>
    %c2_i32_39 = arith.constant 2 : i32
    %123 = vector.broadcast %c2_i32_39 : i32 to vector<4x3xi32>
    %124 = arith.cmpi eq, %28, %123 : vector<4x3xi32>
    %c0_i32_40 = arith.constant 0 : i32
    %125 = vector.shape_cast %115 : vector<4x1xi32> to vector<4x1xi32>
    %126 = vector.broadcast %125 : vector<4x1xi32> to vector<4x3xi32>
    %127 = vector.broadcast %c0_i32_40 : i32 to vector<4x3xi32>
    %128 = arith.select %124, %126, %127 : vector<4x3xi1>, vector<4x3xi32>
    %129 = arith.addi %96, %128 : vector<4x3xi32>
    %c0_41 = arith.constant 0 : index
    %c0_42 = arith.constant 0 : index
    %c0_43 = arith.constant 0 : index
    %130 = vector.load %arg5[%c0_41, %c0_42, %c0_43] : memref<1x4x3xf32, #tpu.memory_space<vmem>>, vector<1x4x3xf32>
    %131 = vector.shape_cast %122 : vector<4x3xf32> to vector<1x4x3xf32>
    %132 = arith.addf %130, %131 : vector<1x4x3xf32>
    %c0_44 = arith.constant 0 : index
    %c0_45 = arith.constant 0 : index
    %c0_46 = arith.constant 0 : index
    %133 = vector.load %arg5[%c0_44, %c0_45, %c0_46] : memref<1x4x3xf32, #tpu.memory_space<vmem>>, vector<1x4x3xf32>
    tpu.vector_store %arg5[%c0_44, %c0_45, %c0_46], %132 {strides = array<i32>} : memref<1x4x3xf32, #tpu.memory_space<vmem>>, vector<1x4x3xf32>,
    %c0_47 = arith.constant 0 : index
    %c0_48 = arith.constant 0 : index
    %c0_49 = arith.constant 0 : index
    %134 = vector.load %arg6[%c0_47, %c0_48, %c0_49] : memref<1x4x3xi32, #tpu.memory_space<vmem>>, vector<1x4x3xi32>
    %135 = vector.shape_cast %129 : vector<4x3xi32> to vector<1x4x3xi32>
    %136 = arith.addi %134, %135 : vector<1x4x3xi32>
    %c0_50 = arith.constant 0 : index
    %c0_51 = arith.constant 0 : index
    %c0_52 = arith.constant 0 : index
    %137 = vector.load %arg6[%c0_50, %c0_51, %c0_52] : memref<1x4x3xi32, #tpu.memory_space<vmem>>, vector<1x4x3xi32>
    tpu.vector_store %arg6[%c0_50, %c0_51, %c0_52], %136 {strides = array<i32>} : memref<1x4x3xi32, #tpu.memory_space<vmem>>, vector<1x4x3xi32>,
    return
  }
  func.func @transform_0(%arg0: i32, %arg1: i32) -> (i32, i32, i32) {
    %c0_i32 = arith.constant 0 : i32
    %c0_i32_0 = arith.constant 0 : i32
    return %arg0, %c0_i32, %arg1 : i32, i32, i32
  }
  func.func @transform_1(%arg0: i32, %arg1: i32) -> (i32, i32, i32) {
    %c0_i32 = arith.constant 0 : i32
    %c0_i32_0 = arith.constant 0 : i32
    return %arg0, %c0_i32, %arg1 : i32, i32, i32
  }
  func.func @transform_2(%arg0: i32, %arg1: i32) -> (i32, i32, i32) {
    %c0_i32 = arith.constant 0 : i32
    %c0_i32_0 = arith.constant 0 : i32
    return %arg0, %c0_i32, %arg1 : i32, i32, i32
  }
  func.func @transform_3(%arg0: i32, %arg1: i32) -> (i32, i32, i32) {
    %c0_i32 = arith.constant 0 : i32
    %c0_i32_0 = arith.constant 0 : i32
    %c0_i32_1 = arith.constant 0 : i32
    return %arg0, %c0_i32, %c0_i32_0 : i32, i32, i32
  }
  func.func @transform_4(%arg0: i32, %arg1: i32) -> (i32, i32, i32) {
    %c0_i32 = arith.constant 0 : i32
    %c0_i32_0 = arith.constant 0 : i32
    %c0_i32_1 = arith.constant 0 : i32
    return %arg0, %c0_i32, %c0_i32_0 : i32, i32, i32
  }
}

</mosaic_0001>

<bundles_post_ra>
// kernel: tpu_custom_call.1
= control target key start
LH: loop header
LB: loop body
LE: loop exit
PB: predicated region body
PF: predicated region fallthrough
CT: control target
= control target key end

     0   :  { %10 = vsyncpa [#allocation3], 0  ;;  %s1249_s0 = inlined_call_operand.hbm [shape: f32[2,1,256], index: 0, kind: input, shape index: {}]   ;;  %s1250_s1 = inlined_call_operand.hbm [shape: f32[2,1,256], index: 1, kind: input, shape index: {}]   ;;  %s1251_s2 = inlined_call_operand.vmem [shape: s32[2,1,256], index: 2, kind: input, shape index: {}]   ;;  %s1252_s3 = inlined_call_operand.vmem [shape: f32[2,4,3], index: 3, kind: output, shape index: {0}]   ;;  %s1253_s4 = inlined_call_operand.vmem [shape: s32[2,4,3], index: 4, kind: output, shape index: {1}]  }
   0x1   :  { %12 = vsyncpa [#allocation3 + $0x1], 0 }
   0x2   :  { %13 = vsyncpa [#allocation5], 0 }
   0x3   :  { %15 = vsyncpa [#allocation5 + $0x1], 0  ;;  %s893_s15 = smov 0   ;;  %s895_s16 = smov 0  }
   0x4   :  { %s897_s17 = smov 0   ;;  %s899_s18 = smov 0  }
   0x5   :  { %s901_s19 = smov 0   ;;  %s903_s20 = smov 0  }
   0x6 LB: > { %s664_s21 = sadd.s32 4294967295, %s862_s20   ;;  %s33_s22 = sadd.s32 1, %s858_s19  ;;  %s862_s20 = sphi %s903_s20, %s21_s20   ;;  %s858_s19 = sphi %s901_s19, %s1283_s19   ;;  %s854_s18 = sphi %s899_s18, %s1282_s18   ;;  %s850_s17 = sphi %s897_s17, %s1281_s17   ;;  %s846_s16 = sphi %s895_s16, %s1280_s16   ;;  %s842_s15 = sphi %s893_s15, %s1279_s15  }
   0x7   : > { %p35_p0 = scmp.ge.s32.totalorder %s33_s22, 2  ;;  %s42_s23 = sadd.s32 1, %s850_s17 }
   0x8   : > { %p49_p1 = scmp.ne.s32.totalorder %s850_s17, %s846_s16  ;;  %p50_p2 = scmp.eq.s32.totalorder %s862_s20, 0 }
   0x9   : > { %s1285_s22 = smov (%p35_p0, %s33_s22), 0  ;;  %p55_p4 = scmp.ne.s32.totalorder %s846_s16, %s842_s15 }
   0xa   : > { %p929_p3 = por %p50_p2, %p49_p1  ;;  %s37_s25 = ssub.s32 %s858_s19, %s1285_s22 }
   0xb   : > { %p56_p5 = scmp.eq.s32.totalorder %s664_s21, 0  ;;  %p40_p6 = scmp.eq.s32.totalorder %s37_s25, 0 }
   0xc   : > { %p695_p8 = scmp.lt.s32.totalorder %s862_s20, 2  ;;  %s945_s28 = sand.u32 1, %s850_s17  }
   0xd   : > { %p936_p7 = por %p56_p5, %p55_p4  ;;  %s682_s29 = sshll.u32 %s858_s19, 5 }
   0xe   : > { %s942_s27 = scalar_select %p40_p6, %s850_s17, %s42_s23  }
   0xf   : > { %s1256_s26 = scalar_select %p936_p7, 1, 0 }
  0x10   : > { %s668_s30 = sshll.u32 %s945_s28, 1  ;;  %s954_s7 = scalar_lea.hbm %s1249_s0, %s682_s29 }
  0x11   : > { %s191_s8 = scalar_lea.vmem [#allocation2], %s668_s30  ;;  %p960_p9 = pnand %p695_p8, %p929_p3 }
  0x12   : > { %s201_s9 = sshll.u32 %s191_s8, 4  ;;  %s188_s11 = scalar_lea.sflag [#allocation3], %s945_s28  ;;  %s964_s9 = int_to_ptr.vmem [resolvable:$true] %s201_s9 }
  0x13   : > { %s748_s12 = scalar_lea.hbm %s954_s7, 32  ;;  %p750_p13 = pneg %p960_p9 }
  0x14   : > { %p749_p12 = scmp.ne.s32.totalorder %s954_s7, %s748_s12  ;;  %s753_s15 = scalar_lea.hbm %s1249_s0, 64 }
  0x15   : > { %p754_p2 = scmp.lt.u32.totalorder %s954_s7, %s1249_s0  ;;  %p755_p3 = scmp.lt.u32.totalorder %s753_s15, %s748_s12 }
  0x16   : > { %p751_p0 = pnand %p750_p13, %p749_p12  ;;  %p757_p5 = scmp.lt.u32.totalorder %s748_s12, %s954_s7 }
  0x17   : > { %p756_p4 = por %p755_p3, %p754_p2 }
  0x18   : > { %p752_p1 = pneg %p751_p0 }
  0x19   : > { %p758_p6 = por %p757_p5, %p756_p4 }
  0x1b   : > { %p759_p8 = pnand %p758_p6, %p752_p1 }
  0x1d   : > { %762 = shalt.err (!%p759_p8)
}
  0x1e   : > { %s763_s24 = scalar_lea.vmem %s964_s9, 32  ;;  %s864_s25 = smov [#allocation2]  }
  0x1f   : > { %p764_p12 = scmp.ne.s32.totalorder %s964_s9, %s763_s24  ;;  %s768_s5 = sshll.u32 %s864_s25, 4  ;;  %s769_s5 = int_to_ptr.vmem [resolvable:$false] %s768_s5 }
  0x20   : > { %s770_s6 = scalar_lea.vmem %s769_s5, 64  ;;  %p771_p11 = scmp.lt.s32.totalorder %s964_s9, %s769_s5 }
  0x21   : > { %p766_p0 = pnand %p764_p12, %p750_p13  ;;  %p772_p2 = scmp.lt.s32.totalorder %s770_s6, %s763_s24 }
  0x23   : > { %p767_p10 = pneg %p766_p0  ;;  %p773_p3 = por %p772_p2, %p771_p11 }
  0x25   : > { %p774_p4 = pnand %p773_p3, %p767_p10 }
  0x27   : > { %777 = shalt.err (!%p774_p4)
}
  0x28   : > { %691 = dma.hbm_to_vmem [thread:$0]  (!%p960_p9), %s954_s7, 32, %s964_s9, %s188_s11  }
  0x29   : > { %p1258_p1 = scmp.lt.s32.totalorder %s862_s20, 3  ;;  %p1259_p5 = scmp.ge.s32.totalorder %s862_s20, 1 }
  0x2a   : > { %s1007_s14 = scalar_lea.hbm %s1250_s1, %s682_s29  ;;  %s212_s15 = scalar_lea.vmem [#allocation4], %s668_s30 }
  0x2b   : > { %p998_p6 = pnand %p1259_p5, %p1258_p1  ;;  %s222_s21 = sshll.u32 %s212_s15, 4  ;;  %s223_s21 = int_to_ptr.vmem [resolvable:$true] %s222_s21 }
  0x2c   : > { %s209_s7 = scalar_lea.sflag [#allocation5], %s945_s28  ;;  %s778_s9 = scalar_lea.hbm %s1007_s14, 32 }
  0x2d   : > { %s1260_s8 = scalar_select %p998_p6, 1, 0 }
  0x2e   : > { %p779_p10 = scmp.ne.s32.totalorder %s1007_s14, %s778_s9  ;;  %s783_s29 = scalar_lea.hbm %s1250_s1, 64 }
  0x2f   : > { %p784_p12 = scmp.lt.u32.totalorder %s1007_s14, %s1250_s1  ;;  %p785_p0 = scmp.lt.u32.totalorder %s783_s29, %s778_s9 }
  0x30   : > { %p781_p11 = pnand %p779_p10, %p750_p13  ;;  %p787_p3 = scmp.lt.u32.totalorder %s778_s9, %s1007_s14 }
  0x31   : > { %p786_p2 = por %p785_p0, %p784_p12 }
  0x32   : > { %p782_p8 = pneg %p781_p11 }
  0x33   : > { %p788_p4 = por %p787_p3, %p786_p2 }
  0x35   : > { %p789_p1 = pnand %p788_p4, %p782_p8 }
  0x37   : > { %792 = shalt.err (!%p789_p1)
}
  0x38   : > { %s793_s28 = scalar_lea.vmem %s223_s21, 32  ;;  %s865_s30 = smov [#allocation4]  }
  0x39   : > { %p794_p5 = scmp.ne.s32.totalorder %s223_s21, %s793_s28  ;;  %s798_s5 = sshll.u32 %s865_s30, 4  ;;  %s799_s5 = int_to_ptr.vmem [resolvable:$false] %s798_s5 }
  0x3a   : > { %s800_s6 = scalar_lea.vmem %s799_s5, 64  ;;  %p801_p7 = scmp.lt.s32.totalorder %s223_s21, %s799_s5 }
  0x3b   : > { %p796_p10 = pnand %p794_p5, %p750_p13  ;;  %p802_p6 = scmp.lt.s32.totalorder %s800_s6, %s793_s28 }
  0x3d   : > { %p797_p11 = pneg %p796_p10  ;;  %p803_p0 = por %p802_p6, %p801_p7 }
  0x3f   : > { %p804_p12 = pnand %p803_p0, %p797_p11 }
  0x41   : > { %807 = shalt.err (!%p804_p12)
}
  0x42   : > { %694 = dma.hbm_to_vmem [thread:$0]  (!%p960_p9), %s1007_s14, 32, %s223_s21, %s209_s7  }
  0x43   : > { %p1261_p8 = scmp.ne.s32.totalorder %s1260_s8, 0 }
  0x44   : > { %s245_s12 = sand.u32 (!%p1261_p8), 1, %s846_s16   ;;  %p1262_p13 = scmp.ne.s32.totalorder (!%p1261_p8), %s1256_s26, 0 }
  0x45   : > { %243 = sbr.rel (%p1261_p8) target bundleno = 262 (0x106), region = 32  ;;  %s675_s13 = sshll.u32 (!%p1261_p8), %s245_s12, 1 }
  0x46   : > { %s246_s15 = scalar_lea.sflag (!%p1261_p8), [#allocation3], %s245_s12  ;;  %s1034_s9 = scalar_lea.vmem (!%p1261_p8), [#allocation2], %s675_s13 }
  0x4c   : > { %833 = dma.done.wait (%p1262_p13), %s246_s15, 32  }
  0x4d   : > { %835 = vsyncadd (%p1262_p13), %s246_s15, 4294967264  ;;  %s255_s11 = scalar_lea.sflag [#allocation5], %s245_s12  ;;  %s258_s10 = scalar_lea.vmem [#allocation4], %s675_s13 }
  0x4e   : > { %837 = dma.done.wait (%p1262_p13), %s255_s11, 32  }
  0x4f   : > { %839 = vsyncadd (%p1262_p13), %s255_s11, 4294967264  ;;  %p302_p7 = scmp.lt.s32.totalorder %s854_s18, 1  ;;  %v327_v0 = vlaneseq  ;;  %v325_v4 = vld [vmem:[%s258_s10] sm:$0x3]  ;;  %v866_v8 = vmov 0   ;;  %vm392_vm12 = vcmask 1043456  }
  0x50   : > { %vm364_vm0 = vcmp.le.f32.partialorder %v325_v4, 1.0  ;;  %vm465_vm1 = vcmp.gt.f32.partialorder %v325_v4, 0.5  ;;  %vm361_vm3 = vcmp.gt.f32.partialorder %v325_v4, 0.0  ;;  %vm362_vm4 = vcmp.le.f32.partialorder %v325_v4, 0.25  ;;  %v326_v21 = vld [vmem:[%s1034_s9] sm:$0x3] }
  0x51   : > { %s1287_s18 = smov (!%p302_p7, %s854_s18), 1  ;;  %v344_v1 = vshrl.u32 %v327_v0, 7  ;;  %vm466_vm2 = vmand %vm465_vm1, %vm364_vm0  ;;  %vm419_vm5 = vcmp.gt.f32.partialorder %v325_v4, 0.25  ;;  %vm420_vm6 = vcmp.le.f32.partialorder %v325_v4, 0.5  ;;  %vm338_vm10 = vcmp.ne.f32.partialorder %v325_v4, 0.0 }
  0x52   : > { %s677_s8 = sshll.u32 %s1287_s18, 1  ;;  %v467_v9 = vsel %vm466_vm2, 1, %v866_v8  ;;  %vm363_vm7 = vmand %vm361_vm3, %vm362_vm4  ;;  %v339_v15 = vsel %vm338_vm10, %v325_v4, 1.0  ;;  %v336_v32 = vsub.f32 %v326_v21, %v325_v4  ;;  %s678_s26 = sshll.u32 %s1287_s18, 2  ;;  %v867_v13 = vmov 0.0  }
  0x53   : > { %v1050_v2 = vsub.s32 0, %v344_v1  ;;  %v1052_v3 = vsub.s32 1, %v344_v1  ;;  %s308_s7 = scalar_lea.vmem %s1251_s2, %s677_s8  ;;  %vm365_vm9 = vmand %vm363_vm7, %vm364_vm0  ;;  %746 = vrcp.f32 %v339_v15  ;;  %s1212_s24 = scalar_lea.vmem %s1252_s3, %s678_s26 }
  0x54   : > { %v342_v5 = vld [vmem:[%s308_s7] sm:$0x3]  ;;  %v366_v14 = vsel %vm365_vm9, 1, %v866_v8  ;;  %vm421_vm13 = vmand %vm419_vm5, %vm420_vm6  ;;  %v337_v45 = vand.u32 2147483647, %v336_v32  ;;  %s1217_s30 = scalar_lea.vmem %s1253_s4, %s678_s26 }
  0x55   : > { %v348_v6 = vrot.slane %v342_v5, %v1050_v2  ;;  %v352_v7 = vrot.slane %v342_v5, %v1052_v3  ;;  %v471_v11 = vrot.slane %v467_v9, %v1050_v2  ;;  %v475_v12 = vrot.slane %v467_v9, %v1052_v3  ;;  %vm422_vm1 = vmand %vm421_vm13, %vm364_vm0 }
  0x56   : > { %v370_v18 = vrot.slane %v366_v14, %v1050_v2  ;;  %v374_v19 = vrot.slane %v366_v14, %v1052_v3  ;;  %v423_v20 = vsel %vm422_vm1, 1, %v866_v8 }
  0x57   : > { %vm1061_vm8 = vcmp.eq.s32.totalorder %v344_v1, %v348_v6  ;;  %vm1068_vm11 = vcmp.eq.s32.totalorder %v344_v1, %v352_v7  ;;  %vm1073_vm14 = vcmp.eq.s32.totalorder %v471_v11, 1  ;;  %vm1077_vm15 = vcmp.eq.s32.totalorder %v475_v12, 1 }
  0x58   : > { %vm478_vm2 = vmand %vm1061_vm8, %vm1073_vm14  ;;  %vm1100_vm0 = vcmp.eq.s32.totalorder %v370_v18, 1  ;;  %vm1104_vm4 = vcmp.eq.s32.totalorder %v374_v19, 1  ;;  %v427_v25 = vrot.slane %v423_v20, %v1050_v2  ;;  %v431_v28 = vrot.slane %v423_v20, %v1052_v3 }
  0x59   : > { %vm479_vm3 = vmand %vm1068_vm11, %vm1077_vm15  ;;  %v487_v22 = vsel %vm478_vm2, 1, %v866_v8 }
  0x5a   : > { %v488_v26 = vsel %vm479_vm3, 1, %v866_v8  ;;  %v489_v27 = vsel %vm392_vm12, %v487_v22, 0  ;;  %vm377_vm5 = vmand %vm1061_vm8, %vm1100_vm0  ;;  %vm1132_vm7 = vcmp.eq.s32.totalorder %v427_v25, 1  ;;  %vm1143_vm9 = vcmp.eq.s32.totalorder %v431_v28, 1 }
  0x5b   : > { %v490_v29 = vsel %vm392_vm12, %v488_v26, 0  ;;  %vm378_vm6 = vmand %vm1068_vm11, %vm1104_vm4  ;;  %v398_v30 = vsel %vm377_vm5, 1, %v866_v8  ;;  %v328_v25 = vand.u32 127, %v327_v0 }
  0x5c   : > { %v491_v33 = vadd.s32 %v490_v29, %v489_v27  ;;  %v399_v34 = vsel %vm378_vm6, 1, %v866_v8  ;;  %v400_v35 = vsel %vm392_vm12, %v398_v30, 0  ;;  %vm434_vm10 = vmand %vm1061_vm8, %vm1132_vm7  ;;  %vm322_vm8 = vcmask 19456  }
  0x5d   : > { %v401_v37 = vsel %vm392_vm12, %v399_v34, 0  ;;  %vm435_vm13 = vmand %vm1068_vm11, %vm1143_vm9  ;;  %v443_v38 = vsel %vm434_vm10, 1, %v866_v8  ;;  %v747_v51 = vpop.eup %746  ;;  %323 = vst.msk [vmem:[%s1212_s24] sm:$0xf] %vm322_vm8, %v867_v13  ;;  %vm460_vm11 = vcmp.eq.s32.totalorder %v328_v25, 1  ;;  %vm504_vm14 = vcmp.eq.s32.totalorder %v328_v25, 2 }
  0x5e   : > { %v493_v39 = vshrl.u32 %v491_v33, 16  ;;  %v492_v40 = vand.u32 65535, %v491_v33  ;;  %v402_v41 = vadd.s32 %v401_v37, %v400_v35  ;;  %v444_v42 = vsel %vm435_vm13, 1, %v866_v8  ;;  %324 = vst.msk [vmem:[%s1217_s30] sm:$0xf] %vm322_vm8, %v866_v8 }
  0x5f   : > { %v445_v43 = vsel %vm392_vm12, %v443_v38, 0  ;;  %v446_v44 = vsel %vm392_vm12, %v444_v42, 0  ;;  %v341_v56 = vmul.f32 %v747_v51, %v337_v45 }
  0x60   : > { %v495_v46 = vcvt.s32.f32 %v493_v39  ;;  %v494_v47 = vcvt.s32.f32 %v492_v40  ;;  %v404_v48 = vshrl.u32 %v402_v41, 16  ;;  %v403_v49 = vand.u32 65535, %v402_v41 }
  0x61   : > { %v447_v50 = vadd.s32 %v446_v44, %v445_v43  ;;  %v383_v57 = vrot.slane %v341_v56, %v1050_v2  ;;  %v387_v58 = vrot.slane %v341_v56, %v1052_v3 }
  0x62   : > { %498 = vadd.xlane.f32.xlu0 %v495_v46  ;;  %496 = vadd.xlane.f32.xlu1 %v494_v47  ;;  %v406_v52 = vcvt.s32.f32 %v404_v48  ;;  %v405_v53 = vcvt.s32.f32 %v403_v49 }
  0x63   : > { %v449_v54 = vshrl.u32 %v447_v50, 16  ;;  %v448_v55 = vand.u32 65535, %v447_v50  ;;  %v436_v61 = vsel %vm434_vm10, %v383_v57, 0.0  ;;  %v437_v62 = vsel %vm435_vm13, %v387_v58, 0.0 }
  0x64   : > { %v390_v63 = vsel %vm377_vm5, %v383_v57, 0.0  ;;  %v391_v1 = vsel %vm378_vm6, %v387_v58, 0.0  ;;  %v438_v2 = vsel %vm392_vm12, %v436_v61, 0.0  ;;  %v439_v3 = vsel %vm392_vm12, %v437_v62, 0.0  ;;  %v509_v43 = vld [vmem:[%s1212_s24] sm:$0xf] }
  0x65   : > { %v451_v59 = vcvt.s32.f32 %v449_v54  ;;  %v450_v60 = vcvt.s32.f32 %v448_v55  ;;  %v393_v4 = vsel %vm392_vm12, %v390_v63, 0.0  ;;  %v394_v5 = vsel %vm392_vm12, %v391_v1, 0.0  ;;  %v513_v44 = vld [vmem:[%s1217_s30] sm:$0xf] }
  0x66   : > { %409 = vadd.xlane.f32.xlu0 %v406_v52  ;;  %407 = vadd.xlane.f32.xlu1 %v405_v53  ;;  %v480_v6 = vsel %vm478_vm2, %v383_v57, 0.0  ;;  %v481_v7 = vsel %vm479_vm3, %v387_v58, 0.0  ;;  %v440_v9 = vadd.f32 %v439_v3, %v438_v2  ;;  %v395_v11 = vadd.f32 %v394_v5, %v393_v4 }
  0x67   : > { %v482_v12 = vsel %vm392_vm12, %v480_v6, 0.0  ;;  %v483_v14 = vsel %vm392_vm12, %v481_v7, 0.0  ;;  %vm415_vm12 = vcmp.eq.s32.totalorder %v328_v25, 0 }
  0x68   : > { %v484_v10 = vadd.f32 %v483_v14, %v482_v12 }
  0x6a   : > { %454 = vadd.xlane.f32.xlu0 %v451_v59  ;;  %452 = vadd.xlane.f32.xlu1 %v450_v60 }
  0x6e   : > { %441 = vadd.xlane.f32.xlu1 %v440_v9  ;;  %396 = vadd.xlane.f32.xlu0 %v395_v11 }
  0x72   : > { %485 = vadd.xlane.f32.xlu0 %v484_v10 }
  0xef   : > { %v499_v15 = vpop.xlane.xlu0 %498  ;;  %v497_v16 = vpop.xlane.xlu1 %496 }
  0xf0   : > { %v501_v19 = vcvt.f32.s32 %v499_v15  ;;  %v500_v27 = vcvt.f32.s32 %v497_v16 }
  0xf2   : > { %v502_v26 = vshll.u32 %v501_v19, 16 }
  0xf3   : > { %v410_v17 = vpop.xlane.xlu0 %409  ;;  %v408_v18 = vpop.xlane.xlu1 %407 }
  0xf4   : > { %v412_v20 = vcvt.f32.s32 %v410_v17  ;;  %v411_v22 = vcvt.f32.s32 %v408_v18  ;;  %v503_v33 = vadd.s32 %v502_v26, %v500_v27 }
  0xf6   : > { %v413_v21 = vshll.u32 %v412_v20, 16  ;;  %v507_v41 = vsel %vm504_vm14, %v503_v33, 0 }
  0xf7   : > { %v455_v23 = vpop.xlane.xlu0 %454  ;;  %v453_v24 = vpop.xlane.xlu1 %452 }
  0xf8   : > { %v457_v28 = vcvt.f32.s32 %v455_v23  ;;  %v456_v29 = vcvt.f32.s32 %v453_v24  ;;  %v414_v30 = vadd.s32 %v413_v21, %v411_v22 }
  0xfa   : > { %v458_v31 = vshll.u32 %v457_v28, 16  ;;  %v418_v37 = vsel %vm415_vm12, %v414_v30, 0 }
  0xfb   : > { %v442_v8 = vpop.xlane.xlu1 %441  ;;  %v397_v32 = vpop.xlane.xlu0 %396 }
  0xfc   : > { %v459_v34 = vadd.s32 %v458_v31, %v456_v29  ;;  %v461_v35 = vsel %vm460_vm11, %v442_v8, 0.0  ;;  %v416_v36 = vsel %vm415_vm12, %v397_v32, 0.0 }
  0xfd   : > { %v462_v39 = vadd.f32 %v461_v35, %v416_v36 }
  0xfe   : > { %v463_v0 = vsel %vm460_vm11, %v459_v34, 0 }
  0xff   : > { %v464_v38 = vadd.s32 %v463_v0, %v418_v37  ;;  %v486_v40 = vpop.xlane.xlu0 %485 }
 0x100   : > { %v505_v42 = vsel %vm504_vm14, %v486_v40, 0.0 }
 0x101   : > { %v508_v45 = vadd.s32 %v507_v41, %v464_v38  ;;  %v506_v46 = vadd.f32 %v505_v42, %v462_v39 }
 0x103   : > { %v510_v47 = vadd.f32 %v509_v43, %v506_v46  ;;  %v514_v48 = vadd.s32 %v513_v44, %v508_v45 }
 0x105   : > { %512 = vst.msk [vmem:[%s1212_s24] sm:$0xf] %vm322_vm8, %v510_v47  ;;  %515 = vst.msk [vmem:[%s1217_s30] sm:$0xf] %vm322_vm8, %v514_v48 }
 0x106 PF: > { %s21_s20 = sadd.s32 1, %s862_s20   ;;  %s1279_s15 = smov %s846_s16 }
 0x107   : > { %p18_p9 = scmp.ge.s32.totalorder %s21_s20, 4   ;;  %s1280_s16 = smov %s850_s17 }
 0x108   : > { %s1281_s17 = smov %s942_s27  ;;  %s1282_s18 = smov %s858_s19 }
 0x109   : > { %s1283_s19 = smov %s1285_s22  ;;  %20 = sbr.rel (!%p18_p9) target bundleno = 6 (0x6), region = 104 }
 0x110   :  { %549 = vsyncpa [#allocation3], 1 }
 0x111   :  { %551 = vsyncpa [#allocation3 + $0x1], 1 }
 0x112   :  { %552 = vsyncpa [#allocation5], 1 }
 0x113   :  { %554 = vsyncpa [#allocation5 + $0x1], 1 }

</bundles_post_ra>
